<compile_context>
chip_gen: v7x
topology: tpu7x:2x2x1
jax: 0.10.0
libtpu: 0.0.40
codegen_flags: <defaults>
</compile_context>

<pallas_src>
import functools

import numpy as np
import jax
import jax.numpy as jnp
from jax import lax
from jax.experimental import pallas as pl
from jax.experimental.pallas import tpu as pltpu


def _round_up(x, m):
    return (x + m - 1) // m * m


# ----------------------------------------------------------------------------
# Operator construction (vectorized numpy; loop only over angles)
# ----------------------------------------------------------------------------
def build_radon_matrix(angles, image_size):
    """Dense nearest-bin parallel-beam Radon matrix A: (n_angles*n_det, P)."""
    n_angles = len(angles)
    n_det = image_size
    coords = np.arange(image_size, dtype=np.float64) - (image_size - 1) / 2.0
    yy, xx = np.meshgrid(coords, coords, indexing="ij")
    radius = (image_size - 1) / 2.0
    circle_mask = ((xx ** 2 + yy ** 2) <= radius ** 2 + 1e-6).ravel()

    P = image_size * image_size
    A = np.zeros((n_angles * n_det, P), dtype=np.float32)
    pix = np.arange(P)
    for ai, theta in enumerate(angles):
        t = xx * np.cos(theta) + yy * np.sin(theta)
        bins = np.clip(np.round(t + (n_det - 1) / 2.0).astype(np.int64),
                       0, n_det - 1).ravel()
        rows = ai * n_det + bins
        A[rows[circle_mask], pix[circle_mask]] = 1.0
    return A


# ----------------------------------------------------------------------------
# Pallas kernel: one MXU pass (x @ G) + Phi / back-projection epilogue
# ----------------------------------------------------------------------------
def proximal_kernel(x_ref, g_ref, o_ref, *, ell2_norm, bp_scale):
    # x_ref : (TM, P) bf16 flattened (zero-padded) images
    # g_ref : (P, P)  bf16 fused Gram operator G = A^T A (resident, 1-buffered)
    # o_ref : (TM, P) f32
    x = x_ref[...]
    # Single bf16 MXU matmul with f32 accumulation: y = (A^T A) x
    y = jnp.dot(x, g_ref[...], preferred_element_type=jnp.float32)
    # ||A x_i||^2 = x_i . (A^T A x_i)  (per-row reduction; cast is a cheap VPU op)
    norm2 = jnp.sum(x.astype(jnp.float32) * y, axis=-1, keepdims=True)
    # Phi scale:  ell2 / max(||Ax||, ell2) = ell2 * rsqrt(max(||Ax||^2, ell2^2))
    # One EUP rsqrt (own VLIW slot) replaces sqrt + max + divide; bp_scale folded in.
    scale = (bp_scale * ell2_norm) * lax.rsqrt(
        jnp.maximum(norm2, ell2_norm * ell2_norm))
    o_ref[...] = scale * y


# ----------------------------------------------------------------------------
# Wrapper
# ----------------------------------------------------------------------------
def _choose_row_tiling(n_rows, granule=16, max_tile=1024):
    """Pick (tm, m_pad): big tiles (HBM roofline), but >=2 grid steps when the
    batch spans >=2 bf16 sublane granules so v7x megacore can shard them."""
    m_pad = _round_up(max(n_rows, 1), granule)
    if m_pad <= granule:
        return m_pad, m_pad                    # tiny batch: single tile
    tm = min(max_tile, _round_up(pl.cdiv(m_pad, 2), granule))
    m_pad = _round_up(m_pad, tm)
    return tm, m_pad


def _compiler_params(tm, P, g_bytes):
    # single-buffered G + double-buffered bf16 in-tile + double-buffered f32 out-tile
    vmem_est = g_bytes + 2 * tm * P * 2 + 2 * tm * P * 4
    kwargs = dict(dimension_semantics=("parallel",))
    # Default scoped VMEM: 16 MiB (v5e) / 32 MiB (v6e, v7x).  Raise only when
    # the resident-G design actually needs it (large P and/or huge row tiles).
    if vmem_est > (12 << 20):
        kwargs["vmem_limit_bytes"] = min(int(vmem_est * 1.25) + (1 << 20),
                                         100 << 20)
    return pltpu.CompilerParams(**kwargs)


def proximal_layer_forward(x_nchw, gram_bf16, *, ell2_norm, bp_scale):
    """x_nchw: (N, C, H, W) float32. Returns (N, C, H, W) float32."""
    N, C, H, W = x_nchw.shape
    P = H * W
    assert gram_bf16.shape == (P, P)

    # The reference Phi uses channel 0 only and broadcasts it to every channel,
    # so only channel 0 contributes to the output.
    # Stream x in bf16 (MXU consumes bf16 anyway): halves HBM->VMEM traffic.
    x_rows = x_nchw[:, 0, :, :].reshape(N, P).astype(jnp.bfloat16)

    tm, m_pad = _choose_row_tiling(N)          # bf16 sublane granule = 16
    if m_pad != N:
        x_rows = jnp.pad(x_rows, ((0, m_pad - N), (0, 0)))

    kernel = functools.partial(proximal_kernel,
                               ell2_norm=float(ell2_norm),
                               bp_scale=float(bp_scale))

    z_rows = pl.pallas_call(
        kernel,
        out_shape=jax.ShapeDtypeStruct((m_pad, P), jnp.float32),
        grid=(m_pad // tm,),
        in_specs=[
            # stream row tiles (default double-buffered)
            pl.BlockSpec((tm, P), lambda i: (i, 0)),
            # fused operator, resident across the grid: constant index_map,
            # single-buffered to halve its VMEM footprint.
            pl.BlockSpec((P, P), lambda i: (0, 0),
                         pipeline_mode=pl.Buffered(1)),
        ],
        out_specs=pl.BlockSpec((tm, P), lambda i: (i, 0)),
        compiler_params=_compiler_params(tm, P, gram_bf16.size * 2),
    )(x_rows, gram_bf16)

    z0 = z_rows[:N].reshape(N, 1, H, W)
    # Reference module writes the (scaled) channel-0 result into every channel.
    # For C == 1 (the CT use case / this demo) this is a no-op; for C > 1 the
    # consumer should keep this broadcast lazy to avoid C x extra HBM writes.
    return jnp.broadcast_to(z0, (N, C, H, W))


if __name__ == "__main__":
    # Small, module-consistent configuration (CT images are single-channel):
    image_size = 16
    n_angles = 8
    angles = np.linspace(0.0, np.pi, n_angles, endpoint=False)

    A = build_radon_matrix(angles, image_size)          # (n_angles*n_det, P)
    bp_scale = np.pi / (2.0 * n_angles)                 # B = bp_scale * A^T
    G = A.T @ A                                         # fused A^T A, integer entries
    gram_bf16 = jnp.asarray(G, dtype=jnp.bfloat16)      # lossless (entries <= n_angles)

    ell2_norm = 30.0                                    # stand-in for data/norm2.npy

    batch, channels = 8, 1
    key = jax.random.PRNGKey(0)
    x = jax.random.normal(key, (batch, channels, image_size, image_size),
                          dtype=jnp.float32)
    # Make image 0 fall inside the ell2 ball so the identity branch of Phi is
    # exercised as well as the scaling branch.
    x = x.at[0].multiply(0.1)

    z = proximal_layer_forward(x, gram_bf16, ell2_norm=ell2_norm, bp_scale=bp_scale)
    z = jax.block_until_ready(z)

    P = image_size * image_size
    x0 = x[:, 0].reshape(batch, P)

    # Check 1: same fused compute path in plain JAX (tight tolerance).
    x_bf = x0.astype(jnp.bfloat16)
    yg = jnp.dot(x_bf, gram_bf16, preferred_element_type=jnp.float32)
    norm2 = jnp.sum(x_bf.astype(jnp.float32) * yg, axis=-1, keepdims=True)
    scale = (bp_scale * ell2_norm) * jax.lax.rsqrt(
        jnp.maximum(norm2, ell2_norm * ell2_norm))
    z_path = (scale * yg).reshape(batch, 1, image_size, image_size)
    np.testing.assert_allclose(np.asarray(z), np.asarray(z_path),
                               rtol=2e-3, atol=2e-3)

    # Check 2: unfused f32 module semantics  z = B(Phi(A x))  (loose tolerance,
    # covers bf16 input/weight quantization and the algebraic fusion).
    A_j = jnp.asarray(A)
    sino = x0 @ A_j.T
    norms = jnp.linalg.norm(sino, axis=1, keepdims=True)
    s2 = jnp.where(norms < ell2_norm, 1.0, ell2_norm / norms)
    z_full = ((s2 * sino) @ (bp_scale * A_j)).reshape(batch, 1,
                                                      image_size, image_size)
    np.testing.assert_allclose(np.asarray(z), np.asarray(z_full),
                               rtol=5e-2, atol=5e-2)

    print("KERNEL_OK")
</pallas_src>

<mosaic_0001>
module attributes {stable_mosaic.version = 11 : i64} {
  func.func @proximal_kernel(%arg0: i32, %arg1: memref<16x256xbf16, #tpu.memory_space<vmem>>, %arg2: memref<256x256xbf16, #tpu.memory_space<vmem>>, %arg3: memref<16x256xf32, #tpu.memory_space<vmem>>) attributes {dimension_semantics = [#tpu.dimension_semantics<parallel>], iteration_bounds = array<i64: 1>, scalar_prefetch = 0 : i64, scratch_operands = 0 : i64, tpu.core_type = #tpu.core_type<tc>, window_params = [{transform_indices = @transform_0, window_bounds = array<i64: 16, 256>}, {pipeline_mode = #tpu.pipeline_mode<synchronous>, transform_indices = @transform_1, window_bounds = array<i64: 256, 256>}, {transform_indices = @transform_2, window_bounds = array<i64: 16, 256>}]} {
    %c0 = arith.constant 0 : index
    %c0_0 = arith.constant 0 : index
    %0 = vector.load %arg1[%c0, %c0_0] : memref<16x256xbf16, #tpu.memory_space<vmem>>, vector<16x256xbf16>
    %c0_1 = arith.constant 0 : index
    %c0_2 = arith.constant 0 : index
    %1 = vector.load %arg2[%c0_1, %c0_2] : memref<256x256xbf16, #tpu.memory_space<vmem>>, vector<256x256xbf16>
    %cst = arith.constant dense<0.000000e+00> : vector<16x256xf32>
    %2 = tpu.matmul %0, %1, %cst {dimension_numbers = #tpu.dot_dimension_numbers<[1], [0], [0], [1], [0, 0, 1, 1], [], []>} : vector<16x256xbf16>, vector<256x256xbf16>, vector<16x256xf32> -> vector<16x256xf32>
    %3 = arith.extf %0 : vector<16x256xbf16> to vector<16x256xf32>
    %4 = arith.mulf %3, %2 : vector<16x256xf32>
    %cst_3 = arith.constant dense<0.000000e+00> : vector<16xf32>
    %5 = vector.multi_reduction <add>, %4, %cst_3 [1] : vector<16x256xf32> to vector<16xf32>
    %6 = vector.shape_cast %5 : vector<16xf32> to vector<16x1xf32>
    %cst_4 = arith.constant 9.000000e+02 : f32
    %7 = vector.broadcast %cst_4 : f32 to vector<16x1xf32>
    %8 = arith.maximumf %6, %7 : vector<16x1xf32>
    %9 = math.rsqrt %8 : vector<16x1xf32>
    %cst_5 = arith.constant 5.89048624 : f32
    %10 = vector.broadcast %cst_5 : f32 to vector<16x1xf32>
    %11 = arith.mulf %10, %9 : vector<16x1xf32>
    %12 = vector.broadcast %11 : vector<16x1xf32> to vector<16x256xf32>
    %13 = arith.mulf %12, %2 : vector<16x256xf32>
    %c0_6 = arith.constant 0 : index
    %c0_7 = arith.constant 0 : index
    %14 = vector.load %arg3[%c0_6, %c0_7] : memref<16x256xf32, #tpu.memory_space<vmem>>, vector<16x256xf32>
    tpu.vector_store %arg3[%c0_6, %c0_7], %13 {strides = array<i32>} : memref<16x256xf32, #tpu.memory_space<vmem>>, vector<16x256xf32>,
    return
  }
  func.func @transform_0(%arg0: i32) -> (i32, i32) {
    %c0_i32 = arith.constant 0 : i32
    %c0_i32_0 = arith.constant 0 : i32
    return %arg0, %c0_i32 : i32, i32
  }
  func.func @transform_1(%arg0: i32) -> (i32, i32) {
    %c0_i32 = arith.constant 0 : i32
    %c0_i32_0 = arith.constant 0 : i32
    %c0_i32_1 = arith.constant 0 : i32
    return %c0_i32, %c0_i32_0 : i32, i32
  }
  func.func @transform_2(%arg0: i32) -> (i32, i32) {
    %c0_i32 = arith.constant 0 : i32
    %c0_i32_0 = arith.constant 0 : i32
    return %arg0, %c0_i32 : i32, i32
  }
}

</mosaic_0001>

<bundles_post_ra>
// kernel: tpu_custom_call.1
= control target key start
LH: loop header
LB: loop body
LE: loop exit
PB: predicated region body
PF: predicated region fallthrough
CT: control target
= control target key end

     0   :  { %7 = vsyncpa [#allocation3], 0  ;;  %s558_s0 = inlined_call_operand.hbm [shape: bf16[16,256], index: 0, kind: input, shape index: {}]   ;;  %s559_s1 = inlined_call_operand.hbm [shape: bf16[256,256], index: 1, kind: input, shape index: {}]   ;;  %s560_s2 = inlined_call_operand.hbm [shape: f32[16,256], index: 2, kind: output, shape index: {}]  }
   0x1   :  { %8 = vsyncpa [#allocation6], 0 }
   0x2   :  { %9 = vsyncpa [#allocation4], 0  ;;  %s500_s9 = smov [#allocation2]   ;;  %s428_s13 = scalar_lea.hbm %s558_s0, 256 }
   0x3   :  { %s15_s10 = sshll.u32 %s500_s9, 4  ;;  %p429_p0 = scmp.ne.s32.totalorder %s558_s0, %s428_s13  ;;  %s16_s10 = int_to_ptr.vmem [resolvable:$true] %s15_s10 }
   0x4   :  { %p432_p1 = scmp.lt.u32.totalorder %s428_s13, %s558_s0 }
   0x6   :  { %p434_p2 = pnand %p432_p1, %p429_p0 }
   0x8   :  { %437 = shalt.err (!%p434_p2)
}
   0x9   :  { %s438_s18 = scalar_lea.vmem %s16_s10, 256  ;;  %p443_p4 = scmp.lt.s32.totalorder %s16_s10, %s16_s10 }
   0xa   :  { %p439_p3 = scmp.ne.s32.totalorder %s16_s10, %s438_s18  ;;  %p444_p5 = scmp.lt.s32.totalorder %s438_s18, %s438_s18 }
   0xc   :  { %p445_p6 = por %p444_p5, %p443_p4 }
   0xe   :  { %p446_p7 = pnand %p445_p6, %p439_p3 }
  0x10   :  { %449 = shalt.err (!%p446_p7)
}
  0x11   :  { %s501_s19 = smov 128   ;;  %s502_s20 = smov 8  }
  0x12   :  { %21 = dma.hbm_to_vmem [thread:$0]  %s558_s0, 256, %s16_s10, [#allocation3], %s501_s19, %s501_s19, %s502_s20  }
  0x13   :  { %s503_s23 = smov [#allocation5]   ;;  %s450_s27 = scalar_lea.hbm %s559_s1, 4096 }
  0x14   :  { %s27_s24 = sshll.u32 %s503_s23, 4  ;;  %p451_p8 = scmp.ne.s32.totalorder %s559_s1, %s450_s27  ;;  %s28_s24 = int_to_ptr.vmem [resolvable:$true] %s27_s24 }
  0x15   :  { %p454_p9 = scmp.lt.u32.totalorder %s450_s27, %s559_s1 }
  0x17   :  { %p456_p10 = pnand %p454_p9, %p451_p8 }
  0x19   :  { %459 = shalt.err (!%p456_p10)
}
  0x1a   :  { %s460_s4 = scalar_lea.vmem %s28_s24, 4096  ;;  %p465_p12 = scmp.lt.s32.totalorder %s28_s24, %s28_s24 }
  0x1b   :  { %p461_p11 = scmp.ne.s32.totalorder %s28_s24, %s460_s4  ;;  %p466_p13 = scmp.lt.s32.totalorder %s460_s4, %s460_s4 }
  0x1d   :  { %p467_p0 = por %p466_p13, %p465_p12 }
  0x1f   :  { %p468_p1 = pnand %p467_p0, %p461_p11 }
  0x21   :  { %471 = shalt.err (!%p468_p1)
}
  0x22   :  { %33 = dma.hbm_to_vmem [thread:$0]  %s559_s1, 4096, %s28_s24, [#allocation6], %s501_s19, %s501_s19, %s502_s20  }
  0x23   :  { %494 = dma.done.wait [#allocation3], 256  }
  0x24   :  { %495 = vsyncadd [#allocation3], 4294967040 }
  0x25   :  { %496 = dma.done.wait [#allocation6], 4096  }
  0x26   :  { %497 = vsyncadd [#allocation6], 4294963200  ;;  %v374_v0 = vld [vmem:[#allocation5 + $0x4] ss:$8 sps:$4 sm:$0xff]   ;;  %v376_v1 = vld [vmem:[#allocation5] ss:$8 sps:$4 sm:$0xff]  }
  0x27   :  { %244 = vmatprep.subr.bf16.mxu0 %v374_v0  ;;  %v377_v2 = vld [vmem:[#allocation5 + $0x14] ss:$8 sps:$4 sm:$0xff]   ;;  %v379_v3 = vld [vmem:[#allocation5 + $0x10] ss:$8 sps:$4 sm:$0xff]   ;;  %v380_v4 = vld [vmem:[#allocation5 + $0x24] ss:$8 sps:$4 sm:$0xff]  }
  0x28   :  { %245 = vmatpush1.bf16.msra.mxu0 %v376_v1  ;;  %v382_v5 = vld [vmem:[#allocation5 + $0x20] ss:$8 sps:$4 sm:$0xff]   ;;  %v383_v6 = vld [vmem:[#allocation5 + $0x34] ss:$8 sps:$4 sm:$0xff]   ;;  %v385_v7 = vld [vmem:[#allocation5 + $0x30] ss:$8 sps:$4 sm:$0xff]  }
  0x29   :  { %246 = vmatprep.subr.bf16.mxu0 %v377_v2  ;;  %v386_v8 = vld [vmem:[#allocation5 + $0x44] ss:$8 sps:$4 sm:$0xff]   ;;  %v388_v9 = vld [vmem:[#allocation5 + $0x40] ss:$8 sps:$4 sm:$0xff]   ;;  %v389_v10 = vld [vmem:[#allocation5 + $0x54] ss:$8 sps:$4 sm:$0xff]  }
  0x2a   :  { %v391_v11 = vld [vmem:[#allocation5 + $0x50] ss:$8 sps:$4 sm:$0xff]   ;;  %v392_v12 = vld [vmem:[#allocation5 + $0x64] ss:$8 sps:$4 sm:$0xff]   ;;  %v394_v16 = vld [vmem:[#allocation5 + $0x60] ss:$8 sps:$4 sm:$0xff]  }
  0x2b   :  { %v40_v13 = vld [vmem:[#allocation2] sm:$0xff]  ;;  %v41_v14 = vld [vmem:[#allocation2 + $0x8] sm:$0xff]  ;;  %v398_v19 = vld [vmem:[#allocation5 + $0x84] ss:$8 sps:$4 sm:$0xff]   ;;  %s504_s1 = smov [#allocation7]  }
  0x2c   :  { %247 = vmatpush1.bf16.msra.mxu0 %v379_v3  ;;  %v334_v15 = vcombine.high %v40_v13, %v41_v14  ;;  %v395_v17 = vld [vmem:[#allocation5 + $0x74] ss:$8 sps:$4 sm:$0xff]   ;;  %v397_v18 = vld [vmem:[#allocation5 + $0x70] ss:$8 sps:$4 sm:$0xff]   ;;  %v400_v20 = vld [vmem:[#allocation5 + $0x80] ss:$8 sps:$4 sm:$0xff]   ;;  %v333_v35 = vcombine.low %v40_v13, %v41_v14  ;;  %v287_v36 = vunpack.c.l.bf16 %v40_v13  ;;  %v288_v37 = vunpack.c.h.bf16 %v40_v13 }
  0x2d   :  { %248 = vmatprep.subr.bf16.mxu0 %v380_v4  ;;  %v401_v21 = vld [vmem:[#allocation5 + $0x94] ss:$8 sps:$4 sm:$0xff]   ;;  %v403_v22 = vld [vmem:[#allocation5 + $0x90] ss:$8 sps:$4 sm:$0xff]   ;;  %v404_v23 = vld [vmem:[#allocation5 + $0xa4] ss:$8 sps:$4 sm:$0xff]   ;;  %v289_v38 = vunpack.c.l.bf16 %v41_v14  ;;  %v290_v40 = vunpack.c.h.bf16 %v41_v14 }
  0x2e   :  { %276 = vmatprep.mubr.bf16.mxu0 %v334_v15  ;;  %v406_v24 = vld [vmem:[#allocation5 + $0xa0] ss:$8 sps:$4 sm:$0xff]   ;;  %v407_v25 = vld [vmem:[#allocation5 + $0xb4] ss:$8 sps:$4 sm:$0xff]   ;;  %v409_v26 = vld [vmem:[#allocation5 + $0xb0] ss:$8 sps:$4 sm:$0xff]  }
  0x2f   :  { %v410_v27 = vld [vmem:[#allocation5 + $0xc4] ss:$8 sps:$4 sm:$0xff]   ;;  %v412_v28 = vld [vmem:[#allocation5 + $0xc0] ss:$8 sps:$4 sm:$0xff]   ;;  %v413_v29 = vld [vmem:[#allocation5 + $0xd4] ss:$8 sps:$4 sm:$0xff]  }
  0x30   :  { %249 = vmatpush1.bf16.msra.mxu0 %v382_v5  ;;  %v415_v30 = vld [vmem:[#allocation5 + $0xd0] ss:$8 sps:$4 sm:$0xff]   ;;  %v416_v31 = vld [vmem:[#allocation5 + $0xe4] ss:$8 sps:$4 sm:$0xff]   ;;  %v418_v32 = vld [vmem:[#allocation5 + $0xe0] ss:$8 sps:$4 sm:$0xff]  }
  0x31   :  { %250 = vmatprep.subr.bf16.mxu0 %v383_v6  ;;  %v419_v33 = vld [vmem:[#allocation5 + $0xf4] ss:$8 sps:$4 sm:$0xff]   ;;  %v421_v34 = vld [vmem:[#allocation5 + $0xf0] ss:$8 sps:$4 sm:$0xff]   ;;  %s320_s6 = sshll.u32 %s504_s1, 4  ;;  %s321_s6 = int_to_ptr.vmem [resolvable:$true] %s320_s6 }
  0x32   :  { %s472_s7 = scalar_lea.vmem %s321_s6, 512  ;;  %p477_p3 = scmp.lt.s32.totalorder %s321_s6, %s321_s6 }
  0x33   :  { %p473_p2 = scmp.ne.s32.totalorder %s321_s6, %s472_s7  ;;  %p478_p4 = scmp.lt.s32.totalorder %s472_s7, %s472_s7 }
  0x34   :  { %251 = vmatpush1.bf16.msra.mxu0 %v385_v7 }
  0x35   :  { %252 = vmatprep.subr.bf16.mxu0 %v386_v8  ;;  %p479_p5 = por %p478_p4, %p477_p3 }
  0x37   :  { %p480_p6 = pnand %p479_p5, %p473_p2 }
  0x38   :  { %253 = vmatpush1.bf16.msra.mxu0 %v388_v9 }
  0x39   :  { %254 = vmatprep.subr.bf16.mxu0 %v389_v10 }
  0x3c   :  { %255 = vmatpush1.bf16.msra.mxu0 %v391_v11 }
  0x3d   :  { %256 = vmatprep.subr.bf16.mxu0 %v392_v12 }
  0x40   :  { %257 = vmatpush1.bf16.msra.mxu0 %v394_v16 }
  0x41   :  { %258 = vmatprep.subr.bf16.mxu0 %v395_v17 }
  0x44   :  { %259 = vmatpush1.bf16.msra.mxu0 %v397_v18 }
  0x45   :  { %260 = vmatprep.subr.bf16.mxu0 %v398_v19 }
  0x48   :  { %261 = vmatpush1.bf16.msra.mxu0 %v400_v20 }
  0x49   :  { %262 = vmatprep.subr.bf16.mxu0 %v401_v21 }
  0x4c   :  { %263 = vmatpush1.bf16.msra.mxu0 %v403_v22 }
  0x4d   :  { %264 = vmatprep.subr.bf16.mxu0 %v404_v23 }
  0x50   :  { %265 = vmatpush1.bf16.msra.mxu0 %v406_v24 }
  0x51   :  { %266 = vmatprep.subr.bf16.mxu0 %v407_v25 }
  0x54   :  { %267 = vmatpush1.bf16.msra.mxu0 %v409_v26 }
  0x55   :  { %268 = vmatprep.subr.bf16.mxu0 %v410_v27 }
  0x58   :  { %269 = vmatpush1.bf16.msra.mxu0 %v412_v28 }
  0x59   :  { %270 = vmatprep.subr.bf16.mxu0 %v413_v29 }
  0x5c   :  { %271 = vmatpush1.bf16.msra.mxu0 %v415_v30 }
  0x5d   :  { %272 = vmatprep.subr.bf16.mxu0 %v416_v31 }
  0x60   :  { %273 = vmatpush1.bf16.msra.mxu0 %v418_v32 }
  0x61   :  { %274 = vmatprep.subr.bf16.mxu0 %v419_v33 }
  0x64   :  { %275 = vmatpush1.bf16.msra.mxu0 %v421_v34 }
  0x67   :  { %277 = vmatmul.mubr.bf16.vlgmr.msra.gmra.mrb[0].mxu0 %v333_v35 }
 0x13a   :  { %v278_v39 = vpop.f32.mrb[0].mxu0 }
 0x13b   :  { %v291_v41 = vmul.f32 %v287_v36, %v278_v39  ;;  %v280_v42 = vpop.f32.mrb[1].mxu0 }
 0x13c   :  { %v292_v43 = vmul.f32 %v288_v37, %v280_v42  ;;  %v282_v44 = vpop.f32.mrb[2].mxu0 }
 0x13d   :  { %v293_v45 = vmul.f32 %v289_v38, %v282_v44  ;;  %v284_v46 = vpop.f32.mrb[3].mxu0 }
 0x13e   :  { %v294_v47 = vmul.f32 %v290_v40, %v284_v46  ;;  %v295_v48 = vadd.f32 %v292_v43, %v291_v41 }
 0x140   :  { %296 = vadd.xlane.f32.xlu0 %v295_v48  ;;  %v298_v49 = vadd.f32 %v294_v47, %v293_v45 }
 0x144   :  { %299 = vadd.xlane.f32.xlu0 %v298_v49 }
 0x1cd   :  { %v297_v50 = vpop.xlane.xlu0 %296 }
 0x1ce   :  { %v301_v51 = vmax.f32 %v297_v50, 900.0 }
 0x1d0   :  { %424 = vrsqrt.f32 %v301_v51 }
 0x1d1   :  { %v300_v52 = vpop.xlane.xlu0 %299 }
 0x1d2   :  { %v302_v53 = vmax.f32 %v300_v52, 900.0 }
 0x1d4   :  { %426 = vrsqrt.f32 %v302_v53 }
 0x1da   :  { %v425_v54 = vpop.eup %424 }
 0x1db   :  { %v305_v55 = vmul.f32 5.8904862, %v425_v54 }
 0x1dd   :  { %v307_v56 = vmul.f32 %v305_v55, %v278_v39  ;;  %v308_v57 = vmul.f32 %v305_v55, %v280_v42 }
 0x1de   :  { %v427_v58 = vpop.eup %426 }
 0x1df   :  { %311 = vst [vmem:[#allocation7] sm:$0xff] %v307_v56  ;;  %312 = vst [vmem:[#allocation7 + $0x8] sm:$0xff] %v308_v57  ;;  %v306_v59 = vmul.f32 5.8904862, %v427_v58 }
 0x1e1   :  { %v309_v60 = vmul.f32 %v306_v59, %v282_v44  ;;  %v310_v61 = vmul.f32 %v306_v59, %v284_v46 }
 0x1e3   :  { %313 = vst [vmem:[#allocation7 + $0x10] sm:$0xff] %v309_v60  ;;  %314 = vst [vmem:[#allocation7 + $0x18] sm:$0xff] %v310_v61 }
 0x1e4   :  { %483 = shalt.err (!%p480_p6)
}
 0x1e5   :  { %s484_s10 = scalar_lea.hbm %s560_s2, 512 }
 0x1e6   :  { %p485_p7 = scmp.ne.s32.totalorder %s560_s2, %s484_s10  ;;  %p488_p8 = scmp.lt.u32.totalorder %s484_s10, %s560_s2 }
 0x1e8   :  { %p490_p9 = pnand %p488_p8, %p485_p7 }
 0x1ea   :  { %493 = shalt.err (!%p490_p9)
}
 0x1eb   :  { %s505_s15 = smov 256   ;;  %s506_s16 = smov 16  }
 0x1ec   :  { %326 = dma.vmem_to_hbm [thread:$0]  %s321_s6, 512, %s560_s2, [#allocation4], %s505_s15, %s505_s15, %s506_s16  }
 0x1ed   :  { %498 = dma.done.wait [#allocation4], 512  }
 0x1ee   :  { %499 = vsyncadd [#allocation4], 4294966784 }
 0x1ef   :  { %330 = vsyncpa [#allocation3], 1 }
 0x1f0   :  { %331 = vsyncpa [#allocation6], 1 }
 0x1f1   :  { %332 = vsyncpa [#allocation4], 1 }

</bundles_post_ra>
